<compile_context>
chip_gen: v7x
topology: tpu7x:2x2x1
jax: 0.10.0
libtpu: 0.0.40
codegen_flags: <defaults>
</compile_context>

<pallas_src>
import jax
import jax.numpy as jnp
from jax.experimental import pallas as pl
from jax.experimental.pallas import tpu as pltpu


_LANE = 128                        # TPU lane width
_MAX_WIDTH = 1024                  # widest lane-dense slab we reshape to
_TARGET_TILE_BYTES = 4 * 1024 * 1024   # ~4 MiB per block (85%+ of HBM roofline)
_MIN_SPLIT_BYTES = 1 * 1024 * 1024     # per-core chunk floor for the 2-way split
_VMEM_LIMIT_BYTES = 32 * 1024 * 1024   # 2x double-buffered 4 MiB tiles + headroom


def _neg_scale_kernel(scale_ref, g_ref, o_ref):
    """grad_in = (-lambda) * grad_out.  -lambda lives in SMEM as f32."""
    neg_lmbda = scale_ref[0, 0]                       # scalar read (SMEM, free slot)
    g = g_ref[...]
    # Multiply in f32, cast on store (bit-parity with a fp32 scalar multiply).
    o_ref[...] = (g.astype(jnp.float32) * neg_lmbda).astype(o_ref.dtype)


def _lane_dense_width(total: int) -> int:
    """Largest multiple of 128 (<= _MAX_WIDTH) dividing `total`, or 0."""
    if total == 0 or total % _LANE != 0:
        return 0
    width = _LANE
    while width * 2 <= _MAX_WIDTH and total % (width * 2) == 0:
        width *= 2
    return width


def _pick_tile_rows(rows: int, width: int, itemsize: int) -> int:
    """Rows per block: ~4 MiB byte budget, sublane-packing aligned, >=2 blocks
    for mid/large slabs so both v7x TensorCores stream."""
    packing = max(1, 4 // itemsize)          # 1 for f32, 2 for bf16, 4 for int8
    align = 8 * packing                      # unmasked packed stores on interior blocks
    row_bytes = width * itemsize
    budget_rows = max(align, (_TARGET_TILE_BYTES // row_bytes) // align * align)

    if rows > budget_rows:
        return budget_rows                   # grid >= 2 automatically

    # Whole slab fits in one block: split into two blocks when it is big
    # enough that both v7x TensorCores driving HBM is a win (no-op on v5e/v6e).
    if rows * row_bytes >= 2 * _MIN_SPLIT_BYTES and rows >= 2 * align:
        half = -(-rows // 2)
        return min(rows, -(-half // align) * align)

    return rows                              # single full-extent block


def _neg_scale(g, lmbda):
    """Compute (-lmbda) * g via a tiled, lane-dense Pallas kernel."""
    neg_lmbda = -jnp.asarray(lmbda, dtype=jnp.float32)

    total = g.size
    width = _lane_dense_width(total)
    if width == 0:
        # Fallback: let XLA fuse the scale with the gradient producer.
        return (g.astype(jnp.float32) * neg_lmbda).astype(g.dtype)

    itemsize = jnp.dtype(g.dtype).itemsize
    rows = total // width
    g2d = g.reshape(rows, width)
    scale = neg_lmbda.reshape(1, 1)

    tile_rows = _pick_tile_rows(rows, width, itemsize)
    grid = (pl.cdiv(rows, tile_rows),)

    out = pl.pallas_call(
        _neg_scale_kernel,
        out_shape=jax.ShapeDtypeStruct((rows, width), g.dtype),
        grid=grid,
        in_specs=[
            pl.BlockSpec(memory_space=pltpu.MemorySpace.SMEM),   # -lambda scalar
            pl.BlockSpec((tile_rows, width), lambda i: (i, 0)),  # cotangent tile
        ],
        out_specs=pl.BlockSpec((tile_rows, width), lambda i: (i, 0)),
        input_output_aliases={1: 0},   # cotangent is dead after the VJP (hint)
        compiler_params=pltpu.CompilerParams(
            dimension_semantics=("parallel",),
            vmem_limit_bytes=_VMEM_LIMIT_BYTES,
        ),
        cost_estimate=pl.CostEstimate(
            flops=total,
            transcendentals=0,
            bytes_accessed=2 * total * itemsize,
        ),
    )(scale, g2d)
    return out.reshape(g.shape)


# --- custom_vjp: identity forward, reversed+scaled backward ------------------

@jax.custom_vjp
def _grl(inputs, lmbda):
    del lmbda
    return inputs


def _grl_fwd(inputs, lmbda):
    # Forward is the identity: no kernel, no extra HBM traffic.
    return inputs, lmbda


def _grl_bwd(lmbda, grad_outputs):
    # lambda is a residual (possibly traced) array -> no recompile per value.
    return _neg_scale(grad_outputs, lmbda), jnp.zeros_like(lmbda)


_grl.defvjp(_grl_fwd, _grl_bwd)


def grl(inputs, lmbda):
    """Gradient Reversal Layer: identity forward, -lambda * grad backward."""
    return _grl(inputs, jnp.asarray(lmbda, dtype=jnp.float32))


class GRL:
    """JAX/Pallas equivalent of the PyTorch GRL module."""

    def __init__(self, lmbda: float) -> None:
        self.lmbda = float(lmbda)

    def __call__(self, inputs):
        return grl(inputs, self.lmbda)


if __name__ == "__main__":
    key = jax.random.PRNGKey(0)
    # Small NCHW input consistent with a conv-feature-map usage of GRL.
    x = jax.random.normal(key, (2, 4, 16, 16), dtype=jnp.float32)

    lmbda = 0.5
    module = GRL(lmbda)

    # Forward: identity.
    y = jax.block_until_ready(module(x))
    assert y.shape == x.shape and y.dtype == x.dtype
    assert bool(jnp.allclose(y, x))

    # Backward Pallas kernel exercised directly (single-block path).
    g_direct = jax.block_until_ready(_neg_scale(x, lmbda))
    assert bool(jnp.allclose(g_direct, -lmbda * x))

    # Autodiff with a TRACED lambda under jit: different lambda values reuse
    # the same compiled kernel (no retrace per schedule step).
    def loss_fn(inp, lam):
        return jnp.sum(grl(inp, lam) * 2.0)

    grad_fn = jax.jit(jax.grad(loss_fn, argnums=0))
    g = jax.block_until_ready(grad_fn(x, jnp.float32(lmbda)))
    assert bool(jnp.allclose(g, jnp.full_like(x, -lmbda * 2.0)))
    g2 = jax.block_until_ready(grad_fn(x, jnp.float32(1.25)))
    assert bool(jnp.allclose(g2, jnp.full_like(x, -1.25 * 2.0)))

    # Backward through the module (closure lambda), matching the PyTorch spec.
    g_mod = jax.block_until_ready(jax.grad(lambda a: jnp.sum(module(a) * 2.0))(x))
    assert bool(jnp.allclose(g_mod, jnp.full_like(x, -lmbda * 2.0)))

    # bf16 cotangents: f32 multiply inside the kernel, cast on store.
    xb = jax.random.normal(key, (4, 8, 64), dtype=jnp.float32).astype(jnp.bfloat16)
    gb = jax.block_until_ready(_neg_scale(xb, lmbda))
    ref_b = (xb.astype(jnp.float32) * (-lmbda)).astype(jnp.bfloat16)
    assert bool(jnp.array_equal(gb, ref_b))

    # Mid-size slab: exercises the 2-way split (>= 2 blocks, "parallel" axis).
    x_split = jnp.full((768, 1024), 2.0, dtype=jnp.float32)      # 3 MiB
    g_split = jax.block_until_ready(_neg_scale(x_split, lmbda))
    assert bool(jnp.allclose(g_split, jnp.full_like(x_split, -lmbda * 2.0)))

    # Larger slab: exercises the byte-budget tiling + ragged last block.
    x_big = jnp.full((1536, 1024), 1.0, dtype=jnp.float32)       # 6 MiB
    g_big = jax.block_until_ready(_neg_scale(x_big, lmbda))
    assert bool(jnp.allclose(g_big, jnp.full_like(x_big, -lmbda)))

    # Element count not a multiple of 128 -> fused-XLA fallback path.
    x_odd = jax.random.normal(key, (3, 5, 7), dtype=jnp.float32)
    g_odd = jax.block_until_ready(jax.grad(lambda a: jnp.sum(module(a)))(x_odd))
    assert bool(jnp.allclose(g_odd, jnp.full_like(x_odd, -lmbda)))

    print("KERNEL_OK")
</pallas_src>

<mosaic_0001>
module attributes {stable_mosaic.version = 11 : i64} {
  func.func @_neg_scale_kernel(%arg0: i32, %arg1: memref<1x1xf32, #tpu.memory_space<smem>>, %arg2: memref<2x1024xf32, #tpu.memory_space<vmem>>, %arg3: memref<2x1024xf32, #tpu.memory_space<vmem>>) attributes {dimension_semantics = [#tpu.dimension_semantics<parallel>], iteration_bounds = array<i64: 1>, scalar_prefetch = 0 : i64, scratch_operands = 0 : i64, tpu.core_type = #tpu.core_type<tc>, window_params = [{transform_indices = @transform_0, window_bounds = array<i64: 1, 1>}, {transform_indices = @transform_1, window_bounds = array<i64: 2, 1024>}, {transform_indices = @transform_2, window_bounds = array<i64: 2, 1024>}]} {
    %c0 = arith.constant 0 : index
    %c0_0 = arith.constant 0 : index
    %0 = memref.load %arg1[%c0, %c0_0] : memref<1x1xf32, #tpu.memory_space<smem>>
    %c0_1 = arith.constant 0 : index
    %c0_2 = arith.constant 0 : index
    %1 = vector.load %arg2[%c0_1, %c0_2] : memref<2x1024xf32, #tpu.memory_space<vmem>>, vector<2x1024xf32>
    %2 = vector.broadcast %0 : f32 to vector<2x1024xf32>
    %3 = arith.mulf %1, %2 : vector<2x1024xf32>
    %c0_3 = arith.constant 0 : index
    %c0_4 = arith.constant 0 : index
    %4 = vector.load %arg3[%c0_3, %c0_4] : memref<2x1024xf32, #tpu.memory_space<vmem>>, vector<2x1024xf32>
    tpu.vector_store %arg3[%c0_3, %c0_4], %3 {strides = array<i32>} : memref<2x1024xf32, #tpu.memory_space<vmem>>, vector<2x1024xf32>,
    return
  }
  func.func @transform_0(%arg0: i32) -> (i32, i32) {
    %c0_i32 = arith.constant 0 : i32
    %c0_i32_0 = arith.constant 0 : i32
    %c0_i32_1 = arith.constant 0 : i32
    return %c0_i32, %c0_i32_0 : i32, i32
  }
  func.func @transform_1(%arg0: i32) -> (i32, i32) {
    %c0_i32 = arith.constant 0 : i32
    %c0_i32_0 = arith.constant 0 : i32
    return %arg0, %c0_i32 : i32, i32
  }
  func.func @transform_2(%arg0: i32) -> (i32, i32) {
    %c0_i32 = arith.constant 0 : i32
    %c0_i32_0 = arith.constant 0 : i32
    return %arg0, %c0_i32 : i32, i32
  }
}

</mosaic_0001>

<bundles_post_ra>
// kernel: tpu_custom_call.1
= control target key start
LH: loop header
LB: loop body
LE: loop exit
PB: predicated region body
PF: predicated region fallthrough
CT: control target
= control target key end

     0   :  { %8 = vsyncpa [#allocation4], 0  ;;  %s142_s0 = inlined_call_operand.<no memory space> [shape: f32[1,1], index: 0, kind: input, shape index: {}]   ;;  %s143_s1 = inlined_call_operand.hbm [shape: f32[2,1024], index: 1, kind: input, shape index: {}, may-alias: {1,2}]   ;;  %s144_s2 = inlined_call_operand.hbm [shape: f32[2,1024], index: 2, kind: output, shape index: {}, may-alias: {1,2}]  }
   0x1   :  { %9 = vsyncpa [#allocation5], 0  ;;  %s98_s9 = smov [#allocation3]   ;;  %s50_s13 = scalar_lea.hbm %s143_s1, 256 }
   0x2   :  { %s18_s10 = sshll.u32 %s98_s9, 4  ;;  %p51_p0 = scmp.ne.s32.totalorder %s143_s1, %s50_s13  ;;  %s19_s10 = int_to_ptr.vmem [resolvable:$true] %s18_s10 }
   0x3   :  { %p54_p1 = scmp.lt.u32.totalorder %s50_s13, %s143_s1 }
   0x5   :  { %p56_p2 = pnand %p54_p1, %p51_p0 }
   0x7   :  { %59 = shalt.err (!%p56_p2)
}
   0x8   :  { %s60_s18 = scalar_lea.vmem %s19_s10, 256  ;;  %p65_p4 = scmp.lt.s32.totalorder %s19_s10, %s19_s10 }
   0x9   :  { %p61_p3 = scmp.ne.s32.totalorder %s19_s10, %s60_s18  ;;  %p66_p5 = scmp.lt.s32.totalorder %s60_s18, %s60_s18 }
   0xb   :  { %p67_p6 = por %p66_p5, %p65_p4 }
   0xd   :  { %p68_p7 = pnand %p67_p6, %p61_p3 }
   0xf   :  { %71 = shalt.err (!%p68_p7)
}
  0x10   :  { %21 = dma.hbm_to_vmem [thread:$0]  %s143_s1, 256, %s19_s10, [#allocation4]  }
  0x11   :  { %94 = dma.done.wait [#allocation4], 256  }
  0x12   :  { %95 = vsyncadd [#allocation4], 4294967040  ;;  %v28_v0 = vstv %s142_s0  ;;  %s99_s23 = smov [#allocation6]   ;;  %v26_v1 = vld [vmem:[#allocation3] sm:$0xff]  ;;  %v27_v2 = vld [vmem:[#allocation3 + $0x8] sm:$0xff] }
  0x13   :  { %s39_s24 = sshll.u32 %s99_s23, 4  ;;  %v29_v3 = vmul.f32 %v28_v0, %v26_v1  ;;  %v30_v4 = vmul.f32 %v28_v0, %v27_v2  ;;  %s40_s24 = int_to_ptr.vmem [resolvable:$true] %s39_s24 }
  0x14   :  { %s72_s25 = scalar_lea.vmem %s40_s24, 256  ;;  %p77_p9 = scmp.lt.s32.totalorder %s40_s24, %s40_s24 }
  0x15   :  { %31 = vst [vmem:[#allocation6] sm:$0xff] %v29_v3  ;;  %32 = vst [vmem:[#allocation6 + $0x8] sm:$0xff] %v30_v4  ;;  %p73_p8 = scmp.ne.s32.totalorder %s40_s24, %s72_s25  ;;  %p78_p10 = scmp.lt.s32.totalorder %s72_s25, %s72_s25 }
  0x17   :  { %p79_p11 = por %p78_p10, %p77_p9 }
  0x19   :  { %p80_p12 = pnand %p79_p11, %p73_p8 }
  0x1b   :  { %83 = shalt.err (!%p80_p12)
}
  0x1c   :  { %s84_s0 = scalar_lea.hbm %s144_s2, 256 }
  0x1d   :  { %p85_p13 = scmp.ne.s32.totalorder %s144_s2, %s84_s0  ;;  %p88_p0 = scmp.lt.u32.totalorder %s84_s0, %s144_s2 }
  0x1f   :  { %p90_p1 = pnand %p88_p0, %p85_p13 }
  0x21   :  { %93 = shalt.err (!%p90_p1)
}
  0x22   :  { %42 = dma.vmem_to_hbm [thread:$0]  %s40_s24, 256, %s144_s2, [#allocation5]  }
  0x23   :  { %96 = dma.done.wait [#allocation5], 256  }
  0x24   :  { %97 = vsyncadd [#allocation5], 4294967040 }
  0x25   :  { %46 = vsyncpa [#allocation4], 1 }
  0x26   :  { %47 = vsyncpa [#allocation5], 1 }

</bundles_post_ra>
